<compile_context>
chip_gen: v6e
topology: v6e:2x2x1
jax: 0.10.0
libtpu: 0.0.40
codegen_flags: <defaults>
</compile_context>

<pallas_src>
import jax
import jax.numpy as jnp
from jax import lax
from jax.experimental import pallas as pl
from jax.experimental.pallas import tpu as pltpu

_LANES = 128
# 4096 rows x 128 lanes x 4 B = 2 MiB per buffer -> ~8 MiB total pipeline
# footprint (double-buffered in + out).  Fits every generation's scoped-VMEM
# default (v5e 16 MiB, v6e 32 MiB, v7x 32 MiB scoped / 64 MiB physical).
_MAX_TILE_ROWS = 4096


def _identity_kernel(x_ref, o_ref):
    # Pure identity: one full-width VMEM load + full-width (lane-dense) store.
    o_ref[...] = x_ref[...]


def _copy_2d_u32(x2d):
    """DMA-pipelined identity copy of a (rows, 128) uint32 array."""
    rows, lanes = x2d.shape
    if rows <= _MAX_TILE_ROWS:
        # Single block equal to the full array dims (exempt from the (8,128)
        # divisibility rule); pipelining is moot for one tile anyway.
        tile_rows = rows
    else:
        # Fixed 2 MiB tile (multiple of 8 sublanes); the partial last block is
        # handled by Pallas masking via the cdiv grid.
        tile_rows = _MAX_TILE_ROWS
    grid = (pl.cdiv(rows, tile_rows),)

    return pl.pallas_call(
        _identity_kernel,
        out_shape=jax.ShapeDtypeStruct(x2d.shape, x2d.dtype),
        grid=grid,
        in_specs=[
            pl.BlockSpec((tile_rows, lanes), lambda i: (i, 0),
                         memory_space=pltpu.MemorySpace.VMEM)
        ],
        out_specs=pl.BlockSpec((tile_rows, lanes), lambda i: (i, 0),
                               memory_space=pltpu.MemorySpace.VMEM),
        compiler_params=pltpu.CompilerParams(
            dimension_semantics=("parallel",)),  # shards grid across v7x's 2 TCs
    )(x2d)


@jax.jit
def _identity_copy(x):
    orig_shape = x.shape
    orig_dtype = x.dtype

    # Degenerate inputs: identity needs no kernel (also fixes the old
    # divide-by-zero for size-0 arrays).
    if x.size == 0 or x.ndim == 0:
        return x

    itemsize = jnp.dtype(orig_dtype).itemsize
    total_bytes = x.size * itemsize

    if itemsize > 4 or total_bytes % (4 * _LANES) != 0:
        # Awkward byte count (not a whole number of 128-lane uint32 rows) or a
        # 64-bit dtype: the op is an identity, so skip the kernel rather than
        # emit masked partial-lane stores or a single oversized block.
        return x

    # Bit-exact uint32 view -> dtype-independent, lane-dense (rows, 128) layout.
    if itemsize == 4:
        words = lax.bitcast_convert_type(x.reshape(-1), jnp.uint32)
    else:
        ratio = 4 // itemsize  # 2 for bf16/f16/int16, 4 for int8/fp8
        words = lax.bitcast_convert_type(x.reshape(-1, ratio), jnp.uint32)

    rows = words.size // _LANES
    out_words = _copy_2d_u32(words.reshape(rows, _LANES)).reshape(-1)

    # Bitcast back to the original dtype and shape.
    out = lax.bitcast_convert_type(out_words, orig_dtype)
    return out.reshape(orig_shape)


def print_layer(x):
    # Torch prints x.shape on every forward; the shape is static, so the side
    # effect is reproduced host-side at call time (outside jit -> fires per call).
    print(tuple(x.shape))
    return _identity_copy(x)


if __name__ == "__main__":
    key = jax.random.PRNGKey(0)
    x = jax.random.normal(key, (2, 4, 16, 16), dtype=jnp.float32)

    y = print_layer(x)
    jax.block_until_ready(y)

    assert y.shape == x.shape
    assert y.dtype == x.dtype
    assert bool(jnp.all(y == x))

    print("KERNEL_OK")
</pallas_src>

<mosaic_0001>
module attributes {stable_mosaic.version = 11 : i64} {
  func.func @_identity_kernel(%arg0: i32, %arg1: memref<16x128xi32, #tpu.memory_space<vmem>>, %arg2: memref<16x128xi32, #tpu.memory_space<vmem>>) attributes {dimension_semantics = [#tpu.dimension_semantics<parallel>], iteration_bounds = array<i64: 1>, scalar_prefetch = 0 : i64, scratch_operands = 0 : i64, tpu.core_type = #tpu.core_type<tc>, window_params = [{transform_indices = @transform_0, window_bounds = array<i64: 16, 128>}, {transform_indices = @transform_1, window_bounds = array<i64: 16, 128>}]} {
    %c0 = arith.constant 0 : index
    %c0_0 = arith.constant 0 : index
    %0 = vector.load %arg1[%c0, %c0_0] : memref<16x128xi32, #tpu.memory_space<vmem>>, vector<16x128xi32>
    %c0_1 = arith.constant 0 : index
    %c0_2 = arith.constant 0 : index
    %1 = vector.load %arg2[%c0_1, %c0_2] : memref<16x128xi32, #tpu.memory_space<vmem>>, vector<16x128xi32>
    tpu.vector_store %arg2[%c0_1, %c0_2], %0 {strides = array<i32>} : memref<16x128xi32, #tpu.memory_space<vmem>>, vector<16x128xi32>,
    return
  }
  func.func @transform_0(%arg0: i32) -> (i32, i32) {
    %c0_i32 = arith.constant 0 : i32
    %c0_i32_0 = arith.constant 0 : i32
    return %arg0, %c0_i32 : i32, i32
  }
  func.func @transform_1(%arg0: i32) -> (i32, i32) {
    %c0_i32 = arith.constant 0 : i32
    %c0_i32_0 = arith.constant 0 : i32
    return %arg0, %c0_i32 : i32, i32
  }
}

</mosaic_0001>

<bundles_post_ra>
// kernel: _identity_copy.1
= control target key start
LH: loop header
LB: loop body
LE: loop exit
PB: predicated region body
PF: predicated region fallthrough
CT: control target
= control target key end

     0   :  { %s38_s0 = inlined_call_operand.vmem [shape: u32[16,128], index: 0, kind: input, shape index: {}]   ;;  %s39_s1 = inlined_call_operand.vmem [shape: u32[16,128], index: 1, kind: output, shape index: {}]  }
   0x1   :  { %v8_v0 = vld [vmem:[%s38_s0] sm:$0xff]  ;;  %v9_v1 = vld [vmem:[%s38_s0 + $0x8] sm:$0xff] }
   0x2   :  { %10 = vst [vmem:[%s39_s1] sm:$0xff] %v8_v0  ;;  %11 = vst [vmem:[%s39_s1 + $0x8] sm:$0xff] %v9_v1 }

</bundles_post_ra>
